<compile_context>
chip_gen: v7x
topology: tpu7x:2x2x1
jax: 0.10.0
libtpu: 0.0.40
codegen_flags: <defaults>
</compile_context>

<pallas_src>
import functools

import jax
import jax.numpy as jnp
from jax.experimental import pallas as pl
from jax.experimental.pallas import tpu as pltpu

_EPS = 1e-5


def _round_up(n, m):
    return (n + m - 1) // m * m


# ----------------------------------------------------------------------------
# In-kernel math helpers (operate on values already loaded from refs)
# ----------------------------------------------------------------------------
def _layernorm(y, g, beta):
    mu = jnp.mean(y, axis=-1, keepdims=True)
    d = y - mu
    var = jnp.mean(d * d, axis=-1, keepdims=True)
    return d * jax.lax.rsqrt(var + _EPS) * g + beta


def _resblock(x, w13, b13, w2, b2, g, beta, dh):
    """ResBlock with fc1/fc3 merged into one MXU pass over the shared input.

    w13 = concat([W1, W3], axis=1), b13 = concat([b1, b3], axis=1);
    computes LayerNorm(relu(x@W1+b1)@W2 + b2 + x@W3 + b3) * g + beta.
    """
    z = jnp.dot(x, w13, preferred_element_type=jnp.float32) + b13
    h = jnp.maximum(z[:, :dh], 0.0)
    y = jnp.dot(h, w2, preferred_element_type=jnp.float32) + b2 + z[:, dh:]
    return _layernorm(y, g, beta)


def _repeat_resblock(h, reps, w13, b13, w2, b2, g, beta, dh):
    """Apply the same shared-weight ResBlock `reps` times to resident h."""
    if reps <= 0:
        return h
    body = lambda _, hh: _resblock(hh, w13, b13, w2, b2, g, beta, dh)
    if reps == 1:
        return body(0, h)
    # Deep stacks: bounded live ranges / code size vs. a static Python unroll.
    return jax.lax.fori_loop(0, reps, body, h, unroll=True)


def _const_spec(a):
    nd = a.ndim
    return pl.BlockSpec(a.shape, lambda *_: (0,) * nd)


# ----------------------------------------------------------------------------
# Kernel 1: feature encoder ResBlock on the exogenous marks (row-blocked grid)
# ----------------------------------------------------------------------------
def _feature_encoder_kernel(x_ref, w13_ref, b13_ref, w2_ref, b2_ref, g_ref,
                            beta_ref, o_ref, *, dh):
    o_ref[...] = _resblock(x_ref[...], w13_ref[...], b13_ref[...], w2_ref[...],
                           b2_ref[...], g_ref[...], beta_ref[...], dh)


def feature_encoder_apply(x, fe, *, row_blk_max=512):
    n, f = x.shape
    dh, e = fe["w2"].shape

    row_blk = min(row_blk_max, _round_up(n, 8))
    n_pad = _round_up(n, row_blk)
    if n_pad != n:
        x = jnp.pad(x, ((0, n_pad - n), (0, 0)))

    weights = (fe["w13"], fe["b13"], fe["w2"], fe["b2"], fe["g"], fe["beta"])
    out = pl.pallas_call(
        functools.partial(_feature_encoder_kernel, dh=dh),
        grid=(n_pad // row_blk,),
        out_shape=jax.ShapeDtypeStruct((n_pad, e), jnp.float32),
        in_specs=([pl.BlockSpec((row_blk, f), lambda i: (i, 0))]
                  + [_const_spec(w) for w in weights]),
        out_specs=pl.BlockSpec((row_blk, e), lambda i: (i, 0)),
        compiler_params=pltpu.CompilerParams(
            dimension_semantics=("parallel",)),
    )(x, *weights)
    return out[:n]


# ----------------------------------------------------------------------------
# Kernel 2: fused instance-norm + encoder/decoder stack + residual + denorm,
# row-blocked over the B*C (batch, channel) rows.
# ----------------------------------------------------------------------------
def _make_tide_main_kernel(*, d_model, e_layers, d_layers):
    dm = d_model

    def kernel(x_ref, ffp_ref, *refs):
        (ef_w13x, ef_w2, ef_b2, ef_g, ef_beta,
         er_w13, er_b13, er_w2, er_b2, er_g, er_beta,
         dr_w13, dr_b13, dr_w2, dr_b2, dr_g, dr_beta,
         dl_w13, dl_b13, dl_w2, dl_b2, dl_g, dl_beta,
         rp_w, rp_b) = refs[:-2]
        out_ref, dec_ref = refs[-2], refs[-1]

        x = x_ref[...]                                   # [R, S] raw history rows

        # ---- per-row (per batch, per channel) instance norm over time ------
        mu = jnp.mean(x, axis=-1, keepdims=True)
        xc = x - mu
        var = jnp.mean(xc * xc, axis=-1, keepdims=True)
        sigma = jnp.sqrt(var + _EPS)
        xn = xc / sigma                                  # [R, S]

        # ---- encoder_first: feature branch (shared across channels) was
        #      precomputed per batch in XLA; ffp already contains b13 ---------
        z = (jnp.dot(xn, ef_w13x[...], preferred_element_type=jnp.float32)
             + ffp_ref[...])                             # [R, 2*dm]
        h = jnp.maximum(z[:, :dm], 0.0)
        y = (jnp.dot(h, ef_w2[...], preferred_element_type=jnp.float32)
             + ef_b2[...] + z[:, dm:])
        h = _layernorm(y, ef_g[...], ef_beta[...])       # [R, dm]

        # ---- shared-weight encoder/decoder repeats; h never leaves VMEM ----
        h = _repeat_resblock(h, e_layers - 1, er_w13[...], er_b13[...],
                             er_w2[...], er_b2[...], er_g[...], er_beta[...], dm)
        h = _repeat_resblock(h, d_layers - 1, dr_w13[...], dr_b13[...],
                             dr_w2[...], dr_b2[...], dr_g[...], dr_beta[...], dm)

        # ---- decoder_last; one lane-dense full-block store ------------------
        dec_ref[...] = _resblock(h, dl_w13[...], dl_b13[...], dl_w2[...],
                                 dl_b2[...], dl_g[...], dl_beta[...], dm)

        # ---- temporal decoder:  LN over a size-1 dim ==> output == its bias,
        #      already folded into rp_b.  Residual projection + de-norm,
        #      single lane-dense [R, P] store. --------------------------------
        res = (jnp.dot(xn, rp_w[...], preferred_element_type=jnp.float32)
               + rp_b[...])                              # [R, P]
        out_ref[...] = res * sigma + mu

    return kernel


def tide_main_apply(x_rows, ffp_rows, pk, *, d_model, pred_len, decode_dim,
                    e_layers, d_layers, row_blk_max=256):
    n, seq_len = x_rows.shape
    dd_p = decode_dim * pred_len

    row_blk = min(row_blk_max, _round_up(n, 8))
    n_pad = _round_up(n, row_blk)
    if n_pad != n:
        x_rows = jnp.pad(x_rows, ((0, n_pad - n), (0, 0)))
        ffp_rows = jnp.pad(ffp_rows, ((0, n_pad - n), (0, 0)))

    p_ef, p_er = pk["enc_first"], pk["enc_rep"]
    p_dr, p_dl = pk["dec_rep"], pk["dec_last"]
    weights = [
        p_ef["w13x"], p_ef["w2"], p_ef["b2"], p_ef["g"], p_ef["beta"],
        p_er["w13"], p_er["b13"], p_er["w2"], p_er["b2"], p_er["g"], p_er["beta"],
        p_dr["w13"], p_dr["b13"], p_dr["w2"], p_dr["b2"], p_dr["g"], p_dr["beta"],
        p_dl["w13"], p_dl["b13"], p_dl["w2"], p_dl["b2"], p_dl["g"], p_dl["beta"],
        pk["rp_w"], pk["rp_b_eff"],
    ]

    kernel = _make_tide_main_kernel(
        d_model=d_model, e_layers=e_layers, d_layers=d_layers)

    in_specs = ([pl.BlockSpec((row_blk, seq_len), lambda i: (i, 0)),
                 pl.BlockSpec((row_blk, 2 * d_model), lambda i: (i, 0))]
                + [_const_spec(w) for w in weights])
    out_specs = (pl.BlockSpec((row_blk, pred_len), lambda i: (i, 0)),
                 pl.BlockSpec((row_blk, dd_p), lambda i: (i, 0)))
    out_shape = (jax.ShapeDtypeStruct((n_pad, pred_len), jnp.float32),
                 jax.ShapeDtypeStruct((n_pad, dd_p), jnp.float32))

    out, dec = pl.pallas_call(
        kernel,
        grid=(n_pad // row_blk,),
        in_specs=in_specs,
        out_specs=out_specs,
        out_shape=out_shape,
        compiler_params=pltpu.CompilerParams(
            dimension_semantics=("parallel",)),   # row blocks shard over the TCs
    )(x_rows, ffp_rows, *weights)
    return out[:n], dec[:n]


# ----------------------------------------------------------------------------
# Parameter construction (raw, PyTorch-like layout) and kernel-ready packing
# ----------------------------------------------------------------------------
def init_linear(key, din, dout):
    k1, k2 = jax.random.split(key)
    bound = 1.0 / (din ** 0.5)
    w = jax.random.uniform(k1, (din, dout), jnp.float32, -bound, bound)
    b = jax.random.uniform(k2, (1, dout), jnp.float32, -bound, bound)
    return w, b


def init_resblock(key, din, dh, dout):
    k1, k2, k3 = jax.random.split(key, 3)
    w1, b1 = init_linear(k1, din, dh)
    w2, b2 = init_linear(k2, dh, dout)
    w3, b3 = init_linear(k3, din, dout)
    return dict(w1=w1, b1=b1, w2=w2, b2=b2, w3=w3, b3=b3,
                g=jnp.ones((1, dout), jnp.float32),
                beta=jnp.zeros((1, dout), jnp.float32))


def init_tide_params(key, *, seq_len, pred_len, feature_dim, feature_encode_dim,
                     d_model, d_ff, decode_dim):
    keys = jax.random.split(key, 7)
    flatten_dim = seq_len + (seq_len + pred_len) * feature_encode_dim
    rp_w, rp_b = init_linear(keys[6], seq_len, pred_len)
    return dict(
        feature_encoder=init_resblock(keys[0], feature_dim, d_model, feature_encode_dim),
        encoder_first=init_resblock(keys[1], flatten_dim, d_model, d_model),
        encoder_rep=init_resblock(keys[2], d_model, d_model, d_model),
        decoder_rep=init_resblock(keys[3], d_model, d_model, d_model),
        decoder_last=init_resblock(keys[4], d_model, d_model, decode_dim * pred_len),
        temporal=init_resblock(keys[5], decode_dim + feature_encode_dim, d_ff, 1),
        rp_w=rp_w, rp_b=rp_b)


def _merge_fc13(rb):
    return dict(w13=jnp.concatenate([rb["w1"], rb["w3"]], axis=1),
                b13=jnp.concatenate([rb["b1"], rb["b3"]], axis=1),
                w2=rb["w2"], b2=rb["b2"], g=rb["g"], beta=rb["beta"])


def pack_tide_params(p, *, seq_len):
    S = seq_len

    fe = _merge_fc13(p["feature_encoder"])

    ef_m = _merge_fc13(p["encoder_first"])
    enc_first = dict(w13x=ef_m["w13"][:S],     # history part  [S, 2*dm]
                     w13f=ef_m["w13"][S:],     # feature part  [(S+P)*E, 2*dm]
                     b13=ef_m["b13"], w2=ef_m["w2"], b2=ef_m["b2"],
                     g=ef_m["g"], beta=ef_m["beta"])

    enc_rep = _merge_fc13(p["encoder_rep"])
    dec_rep = _merge_fc13(p["decoder_rep"])
    dec_last = _merge_fc13(p["decoder_last"])

    # Temporal decoder: its LayerNorm normalises a size-1 output dim, so its
    # output equals its LN bias exactly (matches F.layer_norm bit-for-bit).
    # Fold that scalar into the residual-projection bias.
    rp_b_eff = p["rp_b"] + p["temporal"]["beta"]          # [1, P]

    return dict(fe=fe, enc_first=enc_first, enc_rep=enc_rep, dec_rep=dec_rep,
                dec_last=dec_last, rp_w=p["rp_w"], rp_b_eff=rp_b_eff)


# ----------------------------------------------------------------------------
# TiDE forward: thin JAX glue around the two fused kernels
# ----------------------------------------------------------------------------
def tide_forward_pallas(packed, x_enc, x_mark_enc, x_dec, batch_y_mark, *,
                        d_model, decode_dim, e_layers, d_layers):
    """Returns (output [B, P, C], decoded [B, C, P, decode_dim] aux tensor)."""
    B, S, C = x_enc.shape
    P = x_dec.shape[1]

    # batch_y_mark = cat([x_mark_enc, batch_y_mark[:, -P:, :]], dim=1)
    ymark = jnp.concatenate([x_mark_enc, batch_y_mark[:, -P:, :]], axis=1)
    F = ymark.shape[-1]
    E = packed["fe"]["w2"].shape[1]

    # Kernel 1: feature encoder over all B*(S+P) rows (row-blocked grid).
    feat = feature_encoder_apply(ymark.reshape(B * (S + P), F), packed["fe"])
    feat_flat = feat.reshape(B, (S + P) * E)

    # Hoisted feature branch of encoder_first: one tiny per-batch matmul in
    # XLA (includes b13), then broadcast over the C channels of each batch.
    ffp = (jnp.dot(feat_flat, packed["enc_first"]["w13f"],
                   precision=jax.lax.Precision.HIGHEST)
           + packed["enc_first"]["b13"])                  # [B, 2*dm]
    ffp_rows = jnp.repeat(ffp, C, axis=0)                 # [B*C, 2*dm]

    x_rows = jnp.transpose(x_enc, (0, 2, 1)).reshape(B * C, S)

    # Kernel 2: everything else, fused, row-blocked over B*C rows.
    out_rows, dec_rows = tide_main_apply(
        x_rows, ffp_rows, packed,
        d_model=d_model, pred_len=P, decode_dim=decode_dim,
        e_layers=e_layers, d_layers=d_layers)

    out = jnp.transpose(out_rows.reshape(B, C, P), (0, 2, 1))   # [B, P, C]
    decoded = dec_rows.reshape(B, C, P, decode_dim)
    return out, decoded


# ----------------------------------------------------------------------------
# Pure-JAX reference (mirror of the PyTorch module) for correctness checks
# ----------------------------------------------------------------------------
def _resblock_ref(x, p):
    h = jnp.maximum(x @ p["w1"] + p["b1"], 0.0)
    y = h @ p["w2"] + p["b2"] + x @ p["w3"] + p["b3"]
    mu = jnp.mean(y, axis=-1, keepdims=True)
    d = y - mu
    var = jnp.mean(d * d, axis=-1, keepdims=True)
    return d * jax.lax.rsqrt(var + _EPS) * p["g"] + p["beta"]


def tide_forward_ref(params, x_enc, x_mark_enc, x_dec, batch_y_mark, *,
                     e_layers, d_layers, decode_dim):
    B, S, C = x_enc.shape
    P = x_dec.shape[1]
    Dd = decode_dim

    ymark = jnp.concatenate([x_mark_enc, batch_y_mark[:, -P:, :]], axis=1)
    F = ymark.shape[-1]

    means = jnp.mean(x_enc, axis=1, keepdims=True)
    xc = x_enc - means
    var = jnp.mean(xc * xc, axis=1, keepdims=True)
    stdev = jnp.sqrt(var + _EPS)
    xn = xc / stdev

    feat = _resblock_ref(ymark.reshape(B * (S + P), F), params["feature_encoder"])
    E = feat.shape[-1]
    feat = feat.reshape(B, S + P, E)
    feat_flat = feat.reshape(B, (S + P) * E)

    x_rows = jnp.transpose(xn, (0, 2, 1)).reshape(B * C, S)
    feat_rows = jnp.broadcast_to(feat_flat[:, None, :],
                                 (B, C, (S + P) * E)).reshape(B * C, -1)
    enc_in = jnp.concatenate([x_rows, feat_rows], axis=-1)

    h = _resblock_ref(enc_in, params["encoder_first"])
    for _ in range(e_layers - 1):
        h = _resblock_ref(h, params["encoder_rep"])
    for _ in range(d_layers - 1):
        h = _resblock_ref(h, params["decoder_rep"])
    decoded = _resblock_ref(h, params["decoder_last"]).reshape(B * C, P, Dd)

    feat_pred = feat[:, S:, :]
    feat_pred_rows = jnp.broadcast_to(feat_pred[:, None, :, :],
                                      (B, C, P, E)).reshape(B * C, P, E)
    td_in = jnp.concatenate([feat_pred_rows, decoded],
                            axis=-1).reshape(B * C * P, Dd + E)
    td_out = _resblock_ref(td_in, params["temporal"]).reshape(B * C, P)

    res = x_rows @ params["rp_w"] + params["rp_b"]
    out = td_out + res

    std_bc = stdev[:, 0, :][..., None]
    mean_bc = means[:, 0, :][..., None]
    out = out.reshape(B, C, P) * std_bc + mean_bc
    return jnp.transpose(out, (0, 2, 1)), decoded.reshape(B, C, P, Dd)


# ----------------------------------------------------------------------------
# Main
# ----------------------------------------------------------------------------
if __name__ == "__main__":
    # Small config consistent with the PyTorch module:
    #   freq='h' -> feature_dim=4, d_model=32, d_ff=32, e_layers=2, d_layers=2,
    #   c_out (decode_dim)=2, feature_encode_dim=2,
    #   max_seq_len = seq_len = 16, max_pred_len = pred_len = 8, enc channels = 3.
    B, S, P, C = 2, 16, 8, 3
    FEAT_DIM, FEAT_ENC = 4, 2
    D_MODEL, D_FF, DECODE_DIM = 32, 32, 2
    E_LAYERS, D_LAYERS = 2, 2

    key = jax.random.PRNGKey(0)
    kp, kx, km, kd, ky = jax.random.split(key, 5)

    params = init_tide_params(
        kp, seq_len=S, pred_len=P, feature_dim=FEAT_DIM,
        feature_encode_dim=FEAT_ENC, d_model=D_MODEL, d_ff=D_FF,
        decode_dim=DECODE_DIM)
    packed = pack_tide_params(params, seq_len=S)

    x_enc = jax.random.normal(kx, (B, S, C), jnp.float32)
    x_mark_enc = jax.random.normal(km, (B, S, FEAT_DIM), jnp.float32)
    x_dec = jax.random.normal(kd, (B, P, DECODE_DIM), jnp.float32)
    batch_y_mark = jax.random.normal(ky, (B, S + P, FEAT_DIM), jnp.float32)

    out, dec_k = tide_forward_pallas(
        packed, x_enc, x_mark_enc, x_dec, batch_y_mark,
        d_model=D_MODEL, decode_dim=DECODE_DIM,
        e_layers=E_LAYERS, d_layers=D_LAYERS)
    out = jax.block_until_ready(out)
    dec_k = jax.block_until_ready(dec_k)
    assert out.shape == (B, P, C), out.shape

    # Correctness checks vs. the pure-JAX reference of the PyTorch module.
    ref_out, ref_dec = tide_forward_ref(
        params, x_enc, x_mark_enc, x_dec, batch_y_mark,
        e_layers=E_LAYERS, d_layers=D_LAYERS, decode_dim=DECODE_DIM)
    ref_out = jax.block_until_ready(ref_out)

    assert jnp.allclose(out, ref_out, atol=1e-3, rtol=1e-3), (
        float(jnp.max(jnp.abs(out - ref_out))))

    # The auxiliary decoded output validates the fused encoder/decoder stack,
    # the fc1/fc3 merge and the hoisted feature branch of encoder_first.
    assert jnp.allclose(dec_k, ref_dec, atol=5e-3, rtol=5e-3), (
        float(jnp.max(jnp.abs(dec_k - ref_dec))))

    print("KERNEL_OK")
</pallas_src>

<mosaic_0001>
module attributes {stable_mosaic.version = 11 : i64} {
  func.func @_feature_encoder_kernel(%arg0: i32, %arg1: memref<48x4xf32, #tpu.memory_space<vmem>>, %arg2: memref<4x34xf32, #tpu.memory_space<vmem>>, %arg3: memref<1x34xf32, #tpu.memory_space<vmem>>, %arg4: memref<32x2xf32, #tpu.memory_space<vmem>>, %arg5: memref<1x2xf32, #tpu.memory_space<vmem>>, %arg6: memref<1x2xf32, #tpu.memory_space<vmem>>, %arg7: memref<1x2xf32, #tpu.memory_space<vmem>>, %arg8: memref<48x2xf32, #tpu.memory_space<vmem>>) attributes {dimension_semantics = [#tpu.dimension_semantics<parallel>], iteration_bounds = array<i64: 1>, scalar_prefetch = 0 : i64, scratch_operands = 0 : i64, tpu.core_type = #tpu.core_type<tc>, window_params = [{transform_indices = @transform_0, window_bounds = array<i64: 48, 4>}, {pipeline_mode = #tpu.pipeline_mode<synchronous>, transform_indices = @transform_1, window_bounds = array<i64: 4, 34>}, {pipeline_mode = #tpu.pipeline_mode<synchronous>, transform_indices = @transform_2, window_bounds = array<i64: 1, 34>}, {pipeline_mode = #tpu.pipeline_mode<synchronous>, transform_indices = @transform_3, window_bounds = array<i64: 32, 2>}, {pipeline_mode = #tpu.pipeline_mode<synchronous>, transform_indices = @transform_4, window_bounds = array<i64: 1, 2>}, {pipeline_mode = #tpu.pipeline_mode<synchronous>, transform_indices = @transform_5, window_bounds = array<i64: 1, 2>}, {pipeline_mode = #tpu.pipeline_mode<synchronous>, transform_indices = @transform_6, window_bounds = array<i64: 1, 2>}, {transform_indices = @transform_7, window_bounds = array<i64: 48, 2>}]} {
    %c0 = arith.constant 0 : index
    %c0_0 = arith.constant 0 : index
    %0 = vector.load %arg1[%c0, %c0_0] : memref<48x4xf32, #tpu.memory_space<vmem>>, vector<48x4xf32>
    %c0_1 = arith.constant 0 : index
    %c0_2 = arith.constant 0 : index
    %1 = vector.load %arg2[%c0_1, %c0_2] : memref<4x34xf32, #tpu.memory_space<vmem>>, vector<4x34xf32>
    %c0_3 = arith.constant 0 : index
    %c0_4 = arith.constant 0 : index
    %2 = vector.load %arg3[%c0_3, %c0_4] : memref<1x34xf32, #tpu.memory_space<vmem>>, vector<1x34xf32>
    %c0_5 = arith.constant 0 : index
    %c0_6 = arith.constant 0 : index
    %3 = vector.load %arg4[%c0_5, %c0_6] : memref<32x2xf32, #tpu.memory_space<vmem>>, vector<32x2xf32>
    %c0_7 = arith.constant 0 : index
    %c0_8 = arith.constant 0 : index
    %4 = vector.load %arg5[%c0_7, %c0_8] : memref<1x2xf32, #tpu.memory_space<vmem>>, vector<1x2xf32>
    %c0_9 = arith.constant 0 : index
    %c0_10 = arith.constant 0 : index
    %5 = vector.load %arg6[%c0_9, %c0_10] : memref<1x2xf32, #tpu.memory_space<vmem>>, vector<1x2xf32>
    %c0_11 = arith.constant 0 : index
    %c0_12 = arith.constant 0 : index
    %6 = vector.load %arg7[%c0_11, %c0_12] : memref<1x2xf32, #tpu.memory_space<vmem>>, vector<1x2xf32>
    %cst = arith.constant dense<0.000000e+00> : vector<48x34xf32>
    %7 = tpu.matmul %0, %1, %cst {dimension_numbers = #tpu.dot_dimension_numbers<[1], [0], [0], [1], [0, 0, 1, 1], [], []>} : vector<48x4xf32>, vector<4x34xf32>, vector<48x34xf32> -> vector<48x34xf32>
    %8 = vector.broadcast %2 : vector<1x34xf32> to vector<48x34xf32>
    %9 = arith.addf %7, %8 : vector<48x34xf32>
    %10 = vector.extract_strided_slice %9 {offsets = [0, 0], sizes = [48, 32], strides = [1, 1]} : vector<48x34xf32> to vector<48x32xf32>
    %cst_13 = arith.constant 0.000000e+00 : f32
    %11 = vector.broadcast %cst_13 : f32 to vector<48x32xf32>
    %12 = arith.maximumf %10, %11 : vector<48x32xf32>
    %cst_14 = arith.constant dense<0.000000e+00> : vector<48x2xf32>
    %13 = tpu.matmul %12, %3, %cst_14 {dimension_numbers = #tpu.dot_dimension_numbers<[1], [0], [0], [1], [0, 0, 1, 1], [], []>} : vector<48x32xf32>, vector<32x2xf32>, vector<48x2xf32> -> vector<48x2xf32>
    %14 = vector.broadcast %4 : vector<1x2xf32> to vector<48x2xf32>
    %15 = arith.addf %13, %14 : vector<48x2xf32>
    %16 = vector.extract_strided_slice %9 {offsets = [0, 32], sizes = [48, 2], strides = [1, 1]} : vector<48x34xf32> to vector<48x2xf32>
    %17 = arith.addf %15, %16 : vector<48x2xf32>
    %cst_15 = arith.constant dense<0.000000e+00> : vector<48xf32>
    %18 = vector.multi_reduction <add>, %17, %cst_15 [1] : vector<48x2xf32> to vector<48xf32>
    %19 = vector.shape_cast %18 : vector<48xf32> to vector<48x1xf32>
    %cst_16 = arith.constant 2.000000e+00 : f32
    %20 = vector.broadcast %cst_16 : f32 to vector<48x1xf32>
    %21 = arith.divf %19, %20 : vector<48x1xf32>
    %22 = vector.broadcast %21 : vector<48x1xf32> to vector<48x2xf32>
    %23 = arith.subf %17, %22 : vector<48x2xf32>
    %24 = arith.mulf %23, %23 : vector<48x2xf32>
    %cst_17 = arith.constant dense<0.000000e+00> : vector<48xf32>
    %25 = vector.multi_reduction <add>, %24, %cst_17 [1] : vector<48x2xf32> to vector<48xf32>
    %26 = vector.shape_cast %25 : vector<48xf32> to vector<48x1xf32>
    %cst_18 = arith.constant 2.000000e+00 : f32
    %27 = vector.broadcast %cst_18 : f32 to vector<48x1xf32>
    %28 = arith.divf %26, %27 : vector<48x1xf32>
    %cst_19 = arith.constant 9.99999974E-6 : f32
    %29 = vector.broadcast %cst_19 : f32 to vector<48x1xf32>
    %30 = arith.addf %28, %29 : vector<48x1xf32>
    %31 = math.rsqrt %30 : vector<48x1xf32>
    %32 = vector.broadcast %31 : vector<48x1xf32> to vector<48x2xf32>
    %33 = arith.mulf %23, %32 : vector<48x2xf32>
    %34 = vector.broadcast %5 : vector<1x2xf32> to vector<48x2xf32>
    %35 = arith.mulf %33, %34 : vector<48x2xf32>
    %36 = vector.broadcast %6 : vector<1x2xf32> to vector<48x2xf32>
    %37 = arith.addf %35, %36 : vector<48x2xf32>
    %c0_20 = arith.constant 0 : index
    %c0_21 = arith.constant 0 : index
    %38 = vector.load %arg8[%c0_20, %c0_21] : memref<48x2xf32, #tpu.memory_space<vmem>>, vector<48x2xf32>
    tpu.vector_store %arg8[%c0_20, %c0_21], %37 {strides = array<i32>} : memref<48x2xf32, #tpu.memory_space<vmem>>, vector<48x2xf32>,
    return
  }
  func.func @transform_0(%arg0: i32) -> (i32, i32) {
    %c0_i32 = arith.constant 0 : i32
    %c0_i32_0 = arith.constant 0 : i32
    return %arg0, %c0_i32 : i32, i32
  }
  func.func @transform_1(%arg0: i32) -> (i32, i32) {
    %c0_i32 = arith.constant 0 : i32
    %c0_i32_0 = arith.constant 0 : i32
    %c0_i32_1 = arith.constant 0 : i32
    return %c0_i32, %c0_i32_0 : i32, i32
  }
  func.func @transform_2(%arg0: i32) -> (i32, i32) {
    %c0_i32 = arith.constant 0 : i32
    %c0_i32_0 = arith.constant 0 : i32
    %c0_i32_1 = arith.constant 0 : i32
    return %c0_i32, %c0_i32_0 : i32, i32
  }
  func.func @transform_3(%arg0: i32) -> (i32, i32) {
    %c0_i32 = arith.constant 0 : i32
    %c0_i32_0 = arith.constant 0 : i32
    %c0_i32_1 = arith.constant 0 : i32
    return %c0_i32, %c0_i32_0 : i32, i32
  }
  func.func @transform_4(%arg0: i32) -> (i32, i32) {
    %c0_i32 = arith.constant 0 : i32
    %c0_i32_0 = arith.constant 0 : i32
    %c0_i32_1 = arith.constant 0 : i32
    return %c0_i32, %c0_i32_0 : i32, i32
  }
  func.func @transform_5(%arg0: i32) -> (i32, i32) {
    %c0_i32 = arith.constant 0 : i32
    %c0_i32_0 = arith.constant 0 : i32
    %c0_i32_1 = arith.constant 0 : i32
    return %c0_i32, %c0_i32_0 : i32, i32
  }
  func.func @transform_6(%arg0: i32) -> (i32, i32) {
    %c0_i32 = arith.constant 0 : i32
    %c0_i32_0 = arith.constant 0 : i32
    %c0_i32_1 = arith.constant 0 : i32
    return %c0_i32, %c0_i32_0 : i32, i32
  }
  func.func @transform_7(%arg0: i32) -> (i32, i32) {
    %c0_i32 = arith.constant 0 : i32
    %c0_i32_0 = arith.constant 0 : i32
    return %arg0, %c0_i32 : i32, i32
  }
}

</mosaic_0001>

<bundles_post_ra>
// kernel: tpu_custom_call.1
= control target key start
LH: loop header
LB: loop body
LE: loop exit
PB: predicated region body
PF: predicated region fallthrough
CT: control target
= control target key end

     0   :  { %vm66_vm0 = vcmask 1043456   ;;  %vm47_vm1 = vcmask 31744   ;;  %vm177_vm2 = vcmask 261120   ;;  %vm321_vm3 = vcmask 15360   ;;  %s662_s1 = inlined_call_operand.vmem [shape: f32[4,34], index: 1, kind: input, shape index: {}]   ;;  %s663_s0 = inlined_call_operand.vmem [shape: f32[48,4], index: 0, kind: input, shape index: {}]   ;;  %s664_s3 = inlined_call_operand.vmem [shape: f32[32,2], index: 3, kind: input, shape index: {}]   ;;  %s665_s2 = inlined_call_operand.vmem [shape: f32[1,34], index: 2, kind: input, shape index: {}]   ;;  %s666_s4 = inlined_call_operand.vmem [shape: f32[1,2], index: 4, kind: input, shape index: {}]   ;;  %s667_s5 = inlined_call_operand.vmem [shape: f32[1,2], index: 5, kind: input, shape index: {}]   ;;  %s668_s6 = inlined_call_operand.vmem [shape: f32[1,2], index: 6, kind: input, shape index: {}]   ;;  %s669_s7 = inlined_call_operand.vmem [shape: f32[48,2], index: 7, kind: output, shape index: {}]  }
   0x1   :  { %v32_v0 = vld [vmem:[%s662_s1] sm:$0xf]  ;;  %v27_v2 = vld [vmem:[%s663_s0 + $0x8] sm:$0xff]  ;;  %v28_v3 = vld [vmem:[%s663_s0 + $0x10] sm:$0xff] }
   0x2   :  { %v26_v1 = vld [vmem:[%s663_s0] sm:$0xff]  ;;  %469 = vmatprep.subr.msk.mxu0 %vm66_vm0, %v32_v0  ;;  %v35_v5 = vld [vmem:[%s664_s3 + $0x8] sm:$0xff]  ;;  %v29_v7 = vld [vmem:[%s663_s0 + $0x18] sm:$0xff] }
   0x3   :  { %471 = vmatprep.mubr.msk.f32.mxu0 %vm47_vm1, %v26_v1  ;;  %470 = vmatpush3.msk.msra.mxu0 %vm66_vm0, %v32_v0  ;;  %v34_v4 = vld [vmem:[%s664_s3] sm:$0xff]  ;;  %v31_v9 = vld [vmem:[%s663_s0 + $0x28] sm:$0xff]  ;;  %v36_v10 = vld [vmem:[%s664_s3 + $0x10] sm:$0xff] }
   0x4   :  { %472 = vmatmul.mubr.msk.f32.vlgmr.msra.gmra.mrb[0].mxu0 %vm47_vm1, %v27_v2  ;;  %v497_v6 = vpack.c.bf16 %v35_v5, %v34_v4  ;;  %v30_v8 = vld [vmem:[%s663_s0 + $0x20] sm:$0xff]  ;;  %v37_v11 = vld [vmem:[%s664_s3 + $0x18] sm:$0xff]  ;;  %s518_s0 = smov 96  }
   0x5   :  { %474 = vmatprep.mubr.msk.f32.mxu0 %vm47_vm1, %v28_v3  ;;  %v501_v12 = vpack.c.bf16 %v37_v11, %v36_v10  ;;  %v435_v13 = vld [vmem:[%s665_s2] ss:$0 sm:$0xff] }
   0x6   :  { %498 = vmatprep.subr.bf16.mxu1 %v497_v6  ;;  %v443_v33 = vld [vmem:[%s666_s4] ss:$0 sm:$0xff] }
   0x7   :  { %500 = vmatpush3.bf16.msra.mxu1 %v497_v6 }
   0x8   :  { %475 = vmatmul.mubr.msk.f32.gmra.mrb[2].mxu0 %vm47_vm1, %v29_v7  ;;  %502 = vmatprep.subr.bf16.mxu1 %v501_v12 }
   0x9   :  { %477 = vmatprep.mubr.msk.f32.mxu0 %vm47_vm1, %v30_v8 }
   0xb   :  { %504 = vmatpush3.bf16.msra.mxu1 %v501_v12 }
   0xc   :  { %478 = vmatmul.mubr.msk.f32.gmra.mrb[4].mxu0 %vm47_vm1, %v31_v9 }
  0xd7   :  { %v473_v14 = vpop.f32.mrb[0].mxu0 }
  0xd8   :  { %v142_v15 = vadd.f32 %v473_v14, %v435_v13  ;;  %v136_v16 = vpop.f32.mrb[1].mxu0 }
  0xd9   :  { %v137_v17 = vadd.f32 %v435_v13, %v136_v16 }
  0xda   :  { %299 = vrot.lane.b32.xlu0 %v142_v15, %s518_s0  ;;  %v166_v22 = vmax.f32 %v142_v15, 0.0 }
  0xdb   :  { %v476_v18 = vpop.f32.mrb[2].mxu0  ;;  %v165_v19 = vmax.f32 %v137_v17, 0.0 }
  0xdc   :  { %v152_v20 = vadd.f32 %v476_v18, %v435_v13  ;;  %v146_v21 = vpop.f32.mrb[3].mxu0 }
  0xdd   :  { %v147_v23 = vadd.f32 %v435_v13, %v146_v21  ;;  %488 = vmatprep.mubr.msk.f32.mxu1 %vm177_vm2, %v165_v19 }
  0xde   :  { %303 = vrot.lane.b32.xlu1 %v152_v20, %s518_s0  ;;  %297 = vrot.lane.b32.xlu0 %v137_v17, %s518_s0  ;;  %v168_v24 = vmax.f32 %v152_v20, 0.0 }
  0xdf   :  { %v167_v25 = vmax.f32 %v147_v23, 0.0  ;;  %489 = vmatmul.mubr.msk.f32.vlgmr.msra.gmra.mrb[0].mxu1 %vm177_vm2, %v166_v22  ;;  %v479_v26 = vpop.f32.mrb[4].mxu0 }
  0xe0   :  { %v162_v27 = vadd.f32 %v479_v26, %v435_v13  ;;  %v156_v28 = vpop.f32.mrb[5].mxu0 }
  0xe1   :  { %v157_v29 = vadd.f32 %v435_v13, %v156_v28  ;;  %491 = vmatprep.mubr.msk.f32.mxu1 %vm177_vm2, %v167_v25 }
  0xe2   :  { %301 = vrot.lane.b32.xlu1 %v147_v23, %s518_s0  ;;  %v170_v30 = vmax.f32 %v162_v27, 0.0 }
  0xe3   :  { %v169_v31 = vmax.f32 %v157_v29, 0.0  ;;  %492 = vmatmul.mubr.msk.f32.gmra.mrb[2].mxu1 %vm177_vm2, %v168_v24  ;;  %305 = vrot.lane.b32.xlu0 %v157_v29, %s518_s0 }
  0xe5   :  { %494 = vmatprep.mubr.msk.f32.mxu1 %vm177_vm2, %v169_v31 }
  0xe6   :  { %307 = vrot.lane.b32.xlu1 %v162_v27, %s518_s0 }
  0xe7   :  { %495 = vmatmul.mubr.msk.f32.gmra.mrb[4].mxu1 %vm177_vm2, %v170_v30 }
 0x14c   :  { %v300_v32 = vpop.permute.xlu0 %299 }
 0x150   :  { %v304_v35 = vpop.permute.xlu1 %303  ;;  %v298_v39 = vpop.permute.xlu0 %297 }
 0x154   :  { %v302_v48 = vpop.permute.xlu1 %301 }
 0x155   :  { %v306_v56 = vpop.permute.xlu0 %305 }
 0x158   :  { %v308_v58 = vpop.permute.xlu1 %307 }
 0x1b2   :  { %v490_v34 = vpop.f32.mrb[0].mxu1 }
 0x1b3   :  { %v268_v36 = vadd.f32 %v490_v34, %v443_v33  ;;  %v262_v37 = vpop.f32.mrb[1].mxu1 }
 0x1b4   :  { %v263_v38 = vadd.f32 %v443_v33, %v262_v37 }
 0x1b5   :  { %v316_v40 = vadd.f32 %v300_v32, %v268_v36 }
 0x1b6   :  { %v493_v41 = vpop.f32.mrb[2].mxu1  ;;  %v315_v42 = vadd.f32 %v298_v39, %v263_v38 }
 0x1b7   :  { %v278_v43 = vadd.f32 %v493_v41, %v443_v33  ;;  %v272_v44 = vpop.f32.mrb[3].mxu1  ;;  %v325_v45 = vsel %vm321_vm3, %v316_v40, 0.0 }
 0x1b8   :  { %v273_v46 = vadd.f32 %v443_v33, %v272_v44  ;;  %326 = vadd.xlane.f32.xlu1 %v325_v45  ;;  %v322_v47 = vsel %vm321_vm3, %v315_v42, 0.0 }
 0x1b9   :  { %323 = vadd.xlane.f32.xlu0 %v322_v47  ;;  %v318_v49 = vadd.f32 %v304_v35, %v278_v43 }
 0x1ba   :  { %v496_v50 = vpop.f32.mrb[4].mxu1  ;;  %v317_v55 = vadd.f32 %v302_v48, %v273_v46  ;;  %v450_v46 = vld [vmem:[%s667_s5] ss:$0 sm:$0xff] }
 0x1bb   :  { %v282_v51 = vpop.f32.mrb[5].mxu1  ;;  %v331_v52 = vsel %vm321_vm3, %v318_v49, 0.0  ;;  %v288_v53 = vadd.f32 %v496_v50, %v443_v33 }
 0x1bc   :  { %v283_v54 = vadd.f32 %v443_v33, %v282_v51  ;;  %v328_v60 = vsel %vm321_vm3, %v317_v55, 0.0  ;;  %v451_v51 = vld [vmem:[%s668_s6] ss:$0 sm:$0xff] }
 0x1bd   :  { %332 = vadd.xlane.f32.xlu0 %v331_v52  ;;  %v320_v61 = vadd.f32 %v308_v58, %v288_v53 }
 0x1be   :  { %v319_v57 = vadd.f32 %v306_v56, %v283_v54 }
 0x1bf   :  { %v337_v62 = vsel %vm321_vm3, %v320_v61, 0.0 }
 0x1c0   :  { %v334_v59 = vsel %vm321_vm3, %v319_v57, 0.0 }
 0x1c1   :  { %335 = vadd.xlane.f32.xlu1 %v334_v59  ;;  %329 = vadd.xlane.f32.xlu0 %v328_v60 }
 0x1c5   :  { %338 = vadd.xlane.f32.xlu0 %v337_v62 }
 0x245   :  { %v327_v63 = vpop.xlane.xlu1 %326 }
 0x246   :  { %v342_v0 = vmul.f32 0.5, %v327_v63  ;;  %v324_v1 = vpop.xlane.xlu0 %323 }
 0x247   :  { %v341_v2 = vmul.f32 0.5, %v324_v1 }
 0x248   :  { %v348_v3 = vsub.f32 %v316_v40, %v342_v0 }
 0x249   :  { %v347_v4 = vsub.f32 %v315_v42, %v341_v2 }
 0x24a   :  { %v333_v5 = vpop.xlane.xlu0 %332  ;;  %v354_v6 = vmul.f32 %v348_v3, %v348_v3 }
 0x24b   :  { %v344_v7 = vmul.f32 0.5, %v333_v5  ;;  %v353_v8 = vmul.f32 %v347_v4, %v347_v4 }
 0x24c   :  { %v362_v9 = vsel %vm321_vm3, %v354_v6, 0.0 }
 0x24d   :  { %v617_v10 = vsub.f32 %v318_v49, %v344_v7  ;;  %363 = vadd.xlane.f32.xlu0 %v362_v9  ;;  %v359_v11 = vsel %vm321_vm3, %v353_v8, 0.0 }
 0x24e   :  { %v336_v12 = vpop.xlane.xlu1 %335  ;;  %360 = vadd.xlane.f32.xlu1 %v359_v11  ;;  %v330_v13 = vpop.xlane.xlu0 %329 }
 0x24f   :  { %v345_v14 = vmul.f32 0.5, %v336_v12  ;;  %v343_v15 = vmul.f32 0.5, %v330_v13  ;;  %v356_v16 = vmul.f32 %v617_v10, %v617_v10 }
 0x251   :  { %v622_v17 = vsub.f32 %v319_v57, %v345_v14  ;;  %v349_v18 = vsub.f32 %v317_v55, %v343_v15  ;;  %v368_v19 = vsel %vm321_vm3, %v356_v16, 0.0 }
 0x252   :  { %369 = vadd.xlane.f32.xlu0 %v368_v19  ;;  %v339_v20 = vpop.xlane.xlu0 %338 }
 0x253   :  { %v346_v21 = vmul.f32 0.5, %v339_v20  ;;  %v355_v22 = vmul.f32 %v349_v18, %v349_v18  ;;  %v357_v25 = vmul.f32 %v622_v17, %v622_v17 }
 0x255   :  { %v352_v23 = vsub.f32 %v320_v61, %v346_v21  ;;  %v365_v24 = vsel %vm321_vm3, %v355_v22, 0.0  ;;  %v371_v27 = vsel %vm321_vm3, %v357_v25, 0.0 }
 0x256   :  { %366 = vadd.xlane.f32.xlu1 %v365_v24 }
 0x257   :  { %v358_v26 = vmul.f32 %v352_v23, %v352_v23 }
 0x259   :  { %v374_v28 = vsel %vm321_vm3, %v358_v26, 0.0 }
 0x25a   :  { %372 = vadd.xlane.f32.xlu1 %v371_v27  ;;  %375 = vadd.xlane.f32.xlu0 %v374_v28 }
 0x2da   :  { %v364_v29 = vpop.xlane.xlu0 %363 }
 0x2db   :  { %v378_v30 = vmul.f32 0.5, %v364_v29  ;;  %v361_v31 = vpop.xlane.xlu1 %360 }
 0x2dc   :  { %v377_v32 = vmul.f32 0.5, %v361_v31 }
 0x2dd   :  { %v384_v33 = vadd.f32 1e-05, %v378_v30 }
 0x2de   :  { %v383_v34 = vadd.f32 1e-05, %v377_v32 }
 0x2df   :  { %506 = vrsqrt.f32 %v384_v33  ;;  %v370_v35 = vpop.xlane.xlu0 %369 }
 0x2e0   :  { %508 = vrsqrt.f32 %v383_v34  ;;  %v380_v36 = vmul.f32 0.5, %v370_v35 }
 0x2e2   :  { %v386_v37 = vadd.f32 1e-05, %v380_v36 }
 0x2e3   :  { %v367_v38 = vpop.xlane.xlu1 %366 }
 0x2e4   :  { %510 = vrsqrt.f32 %v386_v37  ;;  %v379_v39 = vmul.f32 0.5, %v367_v38 }
 0x2e6   :  { %v385_v40 = vadd.f32 1e-05, %v379_v39 }
 0x2e7   :  { %v373_v41 = vpop.xlane.xlu1 %372  ;;  %v376_v42 = vpop.xlane.xlu0 %375 }
 0x2e8   :  { %512 = vrsqrt.f32 %v385_v40  ;;  %v381_v43 = vmul.f32 0.5, %v373_v41  ;;  %v382_v44 = vmul.f32 0.5, %v376_v42 }
 0x2e9   :  { %v507_v45 = vpop.eup %506 }
 0x2ea   :  { %v509_v47 = vpop.eup %508  ;;  %v396_v48 = vmul.f32 %v507_v45, %v348_v3  ;;  %v387_v49 = vadd.f32 1e-05, %v381_v43  ;;  %v388_v50 = vadd.f32 1e-05, %v382_v44 }
 0x2eb   :  { %v395_v52 = vmul.f32 %v509_v47, %v347_v4 }
 0x2ec   :  { %v408_v53 = vmul.f32 %v450_v46, %v396_v48  ;;  %514 = vrsqrt.f32 %v387_v49 }
 0x2ed   :  { %v407_v54 = vmul.f32 %v450_v46, %v395_v52  ;;  %516 = vrsqrt.f32 %v388_v50 }
 0x2ee   :  { %v511_v55 = vpop.eup %510  ;;  %v420_v56 = vadd.f32 %v451_v51, %v408_v53 }
 0x2ef   :  { %v419_v57 = vadd.f32 %v451_v51, %v407_v54  ;;  %v398_v58 = vmul.f32 %v511_v55, %v617_v10 }
 0x2f0   :  { %426 = vst.msk [vmem:[%s669_s7 + $0x8] sm:$0xff] %vm321_vm3, %v420_v56 }
 0x2f1   :  { %425 = vst.msk [vmem:[%s669_s7] sm:$0xff] %vm321_vm3, %v419_v57  ;;  %v410_v59 = vmul.f32 %v450_v46, %v398_v58 }
 0x2f2   :  { %v513_v60 = vpop.eup %512 }
 0x2f3   :  { %v422_v61 = vadd.f32 %v451_v51, %v410_v59  ;;  %v397_v62 = vmul.f32 %v513_v60, %v349_v18 }
 0x2f5   :  { %428 = vst.msk [vmem:[%s669_s7 + $0x18] sm:$0xff] %vm321_vm3, %v422_v61  ;;  %v409_v63 = vmul.f32 %v450_v46, %v397_v62 }
 0x2f6   :  { %v515_v0 = vpop.eup %514 }
 0x2f7   :  { %v517_v1 = vpop.eup %516  ;;  %v421_v2 = vadd.f32 %v451_v51, %v409_v63  ;;  %v399_v3 = vmul.f32 %v515_v0, %v622_v17 }
 0x2f8   :  { %v400_v4 = vmul.f32 %v517_v1, %v352_v23 }
 0x2f9   :  { %427 = vst.msk [vmem:[%s669_s7 + $0x10] sm:$0xff] %vm321_vm3, %v421_v2  ;;  %v411_v5 = vmul.f32 %v450_v46, %v399_v3 }
 0x2fa   :  { %v412_v6 = vmul.f32 %v450_v46, %v400_v4 }
 0x2fb   :  { %v423_v7 = vadd.f32 %v451_v51, %v411_v5 }
 0x2fc   :  { %v424_v8 = vadd.f32 %v451_v51, %v412_v6 }
 0x2fd   :  { %429 = vst.msk [vmem:[%s669_s7 + $0x20] sm:$0xff] %vm321_vm3, %v423_v7 }
 0x2fe   :  { %430 = vst.msk [vmem:[%s669_s7 + $0x28] sm:$0xff] %vm321_vm3, %v424_v8 }

</bundles_post_ra>
